<compile_context>
chip_gen: v7x
topology: tpu7x:2x2x1
jax: 0.10.0
libtpu: 0.0.40
codegen_flags: <defaults>
</compile_context>

<pallas_src>
import jax
import jax.numpy as jnp
from jax.experimental import pallas as pl
from jax.experimental.pallas import tpu as pltpu

LANES = 128


def _add_kernel(a_ref, b_ref, o_ref):
    # Elementwise add of one VMEM tile (the entire hot path of GraphEhanced).
    o_ref[...] = a_ref[...] + b_ref[...]


def _sublanes_for(dtype):
    # Sub-32-bit dtypes pack along sublanes: 8 rows for 4-byte, 16 for
    # 2-byte, 32 for 1-byte elements.
    itemsize = jnp.dtype(dtype).itemsize
    return max(8, 32 // max(itemsize, 1))


def _round_up(x, m):
    return ((x + m - 1) // m) * m


def _chip_config():
    """Per-generation (tile_bytes, num_tensorcores, vmem_limit_bytes)."""
    tile_bytes = 2 * 1024 * 1024   # conservative default: safe on v5e (16 MiB scoped VMEM)
    num_tcs = 1
    vmem_limit = None
    try:
        kind = jax.devices()[0].device_kind.lower()
    except Exception:  # pragma: no cover - defensive; keep conservative defaults
        kind = ""
    if "v7" in kind:
        # 3 operands x 2 buffers x 8 MiB = 48 MiB; fits 64 MiB physical VMEM
        # but exceeds the 32 MiB default scoped limit -> raise it explicitly.
        tile_bytes = 8 * 1024 * 1024
        num_tcs = 2
        vmem_limit = 52 * 1024 * 1024
    elif "v6" in kind:
        # 3 x 2 x 4 MiB = 24 MiB, inside the 32 MiB default scoped VMEM.
        tile_bytes = 4 * 1024 * 1024
        num_tcs = 1
    elif "v4" in kind or "v5p" in kind:
        # Megacore chips: keep conservative tile size, but allow the 2-way
        # split / even-step balancing so "parallel" can shard across cores.
        num_tcs = 2
    return tile_bytes, num_tcs, vmem_limit


def _compute_tiling(rows, sublanes, tile_bytes, itemsize, num_tcs):
    """Pick (tile_rows, grid_steps) for a (rows, 128) slab."""
    tile_rows_cap = max(
        sublanes, (tile_bytes // (LANES * itemsize)) // sublanes * sublanes)

    if rows <= tile_rows_cap:
        if num_tcs >= 2 and rows > sublanes:
            # Split small/medium inputs >=2 ways only when there are 2 TCs to
            # shard the "parallel" axis across; on 1-TC chips this would just
            # add a pipeline step + a masked edge store.
            half = _round_up(pl.cdiv(rows, 2), sublanes)
            tile_rows = half if half < rows else rows
        else:
            tile_rows = rows
    else:
        tile_rows = tile_rows_cap
        if num_tcs >= 2:
            steps = pl.cdiv(rows, tile_rows)
            if steps % 2 == 1 and steps > 1:
                # Rebalance to an even step count so neither TC gets an extra
                # (e.g. 2/3 of) share of the mem-bound work.
                tile_rows = max(sublanes,
                                _round_up(pl.cdiv(rows, steps + 1), sublanes))

    return tile_rows, pl.cdiv(rows, tile_rows)


def graph_enhanced_forward(last_input, h0, layer_index=0, *, donate_last_input=False):
    """Pallas implementation of GraphEhanced.forward (last_input + h0).

    layer_index is unused by the reference forward (kept for signature parity).
    donate_last_input=True only pays off if the enclosing jit actually donates
    last_input's buffer (donate_argnums); otherwise XLA inserts a copy.
    """
    assert last_input.shape == h0.shape, "inputs must have identical shapes"
    assert last_input.dtype == h0.dtype

    orig_shape = last_input.shape
    dtype = last_input.dtype
    itemsize = jnp.dtype(dtype).itemsize
    n_elems = int(last_input.size)
    sublanes = _sublanes_for(dtype)
    tile_bytes, num_tcs, vmem_limit = _chip_config()

    rows_aligned = n_elems // LANES
    rem = n_elems - rows_aligned * LANES

    if rows_aligned == 0:
        # Tiny input (<128 elems): per-step DMA overhead dwarfs the add.
        return last_input + h0

    a_flat = last_input.reshape(-1)
    b_flat = h0.reshape(-1)
    n_aligned = rows_aligned * LANES
    a2d = a_flat[:n_aligned].reshape(rows_aligned, LANES)
    b2d = b_flat[:n_aligned].reshape(rows_aligned, LANES)

    tile_rows, grid_steps = _compute_tiling(
        rows_aligned, sublanes, tile_bytes, itemsize, num_tcs)

    # Aliasing only makes sense when the kernel covers the whole tensor; in
    # the ragged case the alias would target a sliced temporary anyway.
    alias = {0: 0} if (donate_last_input and rem == 0) else {}

    n_bytes = n_aligned * itemsize
    cost = pl.CostEstimate(
        flops=n_aligned,
        transcendentals=0,
        bytes_accessed=(2 if alias else 3) * n_bytes,
    )

    cp_kwargs = dict(dimension_semantics=("parallel",))
    if vmem_limit is not None:
        cp_kwargs["vmem_limit_bytes"] = vmem_limit

    out2d = pl.pallas_call(
        _add_kernel,
        out_shape=jax.ShapeDtypeStruct((rows_aligned, LANES), dtype),
        grid_spec=pltpu.PrefetchScalarGridSpec(
            num_scalar_prefetch=0,
            grid=(grid_steps,),
            in_specs=[
                pl.BlockSpec((tile_rows, LANES), lambda i: (i, 0)),
                pl.BlockSpec((tile_rows, LANES), lambda i: (i, 0)),
            ],
            out_specs=pl.BlockSpec((tile_rows, LANES), lambda i: (i, 0)),
        ),
        compiler_params=pltpu.CompilerParams(**cp_kwargs),
        input_output_aliases=alias,
        cost_estimate=cost,
    )(a2d, b2d)

    out_flat = out2d.reshape(-1)
    if rem:
        # <=127-element remainder: plain jnp add, no pad/slice of the full
        # inputs (the old fallback cost ~2x the add itself).
        tail = a_flat[n_aligned:] + b_flat[n_aligned:]
        out_flat = jnp.concatenate([out_flat, tail])
    return out_flat.reshape(orig_shape)


if __name__ == "__main__":
    # Small NCHW example consistent with a GNN/conv feature map.
    B, C, H, W = 2, 4, 16, 16
    key = jax.random.PRNGKey(0)
    k1, k2 = jax.random.split(key)
    last_input = jax.random.normal(k1, (B, C, H, W), dtype=jnp.float32)
    h0 = jax.random.normal(k2, (B, C, H, W), dtype=jnp.float32)
    ref = last_input + h0

    # Default path (no aliasing).
    out = graph_enhanced_forward(last_input, h0, layer_index=0)
    out = jax.block_until_ready(out)
    assert out.shape == ref.shape
    assert jnp.allclose(out, ref, atol=1e-6, rtol=1e-6)

    # Opt-in aliased path (only a real in-place write if the caller donates).
    out_alias = graph_enhanced_forward(last_input, h0, layer_index=0,
                                       donate_last_input=True)
    out_alias = jax.block_until_ready(out_alias)
    assert jnp.allclose(out_alias, ref, atol=1e-6, rtol=1e-6)

    # Ragged-tail path (numel not a multiple of 128): kernel on the aligned
    # prefix + jnp add on the remainder.
    kr1, kr2 = jax.random.split(k2)
    xr = jax.random.normal(kr1, (3, 5, 7, 11), dtype=jnp.float32)
    yr = jax.random.normal(kr2, (3, 5, 7, 11), dtype=jnp.float32)
    outr = jax.block_until_ready(graph_enhanced_forward(xr, yr))
    assert jnp.allclose(outr, xr + yr, atol=1e-6, rtol=1e-6)

    # Tiny-input path (<128 elems) exercises the plain-add fallback.
    xs = jax.random.normal(kr1, (3, 7), dtype=jnp.float32)
    ys = jax.random.normal(kr2, (3, 7), dtype=jnp.float32)
    outs = jax.block_until_ready(graph_enhanced_forward(xs, ys))
    assert jnp.allclose(outs, xs + ys, atol=1e-6, rtol=1e-6)

    print("KERNEL_OK")
</pallas_src>

<mosaic_0001>
module attributes {stable_mosaic.version = 11 : i64} {
  func.func @_add_kernel(%arg0: i32, %arg1: memref<16x128xf32, #tpu.memory_space<vmem>>, %arg2: memref<16x128xf32, #tpu.memory_space<vmem>>, %arg3: memref<16x128xf32, #tpu.memory_space<vmem>>) attributes {dimension_semantics = [#tpu.dimension_semantics<parallel>], iteration_bounds = array<i64: 1>, scalar_prefetch = 0 : i64, scratch_operands = 0 : i64, tpu.core_type = #tpu.core_type<tc>, window_params = [{transform_indices = @transform_0, window_bounds = array<i64: 16, 128>}, {transform_indices = @transform_1, window_bounds = array<i64: 16, 128>}, {transform_indices = @transform_2, window_bounds = array<i64: 16, 128>}]} {
    %c0 = arith.constant 0 : index
    %c0_0 = arith.constant 0 : index
    %0 = vector.load %arg1[%c0, %c0_0] : memref<16x128xf32, #tpu.memory_space<vmem>>, vector<16x128xf32>
    %c0_1 = arith.constant 0 : index
    %c0_2 = arith.constant 0 : index
    %1 = vector.load %arg2[%c0_1, %c0_2] : memref<16x128xf32, #tpu.memory_space<vmem>>, vector<16x128xf32>
    %2 = arith.addf %0, %1 : vector<16x128xf32>
    %c0_3 = arith.constant 0 : index
    %c0_4 = arith.constant 0 : index
    %3 = vector.load %arg3[%c0_3, %c0_4] : memref<16x128xf32, #tpu.memory_space<vmem>>, vector<16x128xf32>
    tpu.vector_store %arg3[%c0_3, %c0_4], %2 {strides = array<i32>} : memref<16x128xf32, #tpu.memory_space<vmem>>, vector<16x128xf32>,
    return
  }
  func.func @transform_0(%arg0: i32) -> (i32, i32) {
    %c0_i32 = arith.constant 0 : i32
    %c0_i32_0 = arith.constant 0 : i32
    return %arg0, %c0_i32 : i32, i32
  }
  func.func @transform_1(%arg0: i32) -> (i32, i32) {
    %c0_i32 = arith.constant 0 : i32
    %c0_i32_0 = arith.constant 0 : i32
    return %arg0, %c0_i32 : i32, i32
  }
  func.func @transform_2(%arg0: i32) -> (i32, i32) {
    %c0_i32 = arith.constant 0 : i32
    %c0_i32_0 = arith.constant 0 : i32
    return %arg0, %c0_i32 : i32, i32
  }
}

</mosaic_0001>

<bundles_post_ra>
// kernel: tpu_custom_call.1
= control target key start
LH: loop header
LB: loop body
LE: loop exit
PB: predicated region body
PF: predicated region fallthrough
CT: control target
= control target key end

     0   :  { %7 = vsyncpa [#allocation3], 0  ;;  %s208_s0 = inlined_call_operand.hbm [shape: f32[16,128], index: 0, kind: input, shape index: {}]   ;;  %s209_s1 = inlined_call_operand.hbm [shape: f32[16,128], index: 1, kind: input, shape index: {}]   ;;  %s210_s2 = inlined_call_operand.hbm [shape: f32[16,128], index: 2, kind: output, shape index: {}]  }
   0x1   :  { %8 = vsyncpa [#allocation6], 0 }
   0x2   :  { %9 = vsyncpa [#allocation4], 0  ;;  %s143_s9 = smov [#allocation2]   ;;  %s71_s13 = scalar_lea.hbm %s208_s0, 256 }
   0x3   :  { %s15_s10 = sshll.u32 %s143_s9, 4  ;;  %p72_p0 = scmp.ne.s32.totalorder %s208_s0, %s71_s13  ;;  %s16_s10 = int_to_ptr.vmem [resolvable:$true] %s15_s10 }
   0x4   :  { %p75_p1 = scmp.lt.u32.totalorder %s71_s13, %s208_s0 }
   0x6   :  { %p77_p2 = pnand %p75_p1, %p72_p0 }
   0x8   :  { %80 = shalt.err (!%p77_p2)
}
   0x9   :  { %s81_s18 = scalar_lea.vmem %s16_s10, 256  ;;  %p86_p4 = scmp.lt.s32.totalorder %s16_s10, %s16_s10 }
   0xa   :  { %p82_p3 = scmp.ne.s32.totalorder %s16_s10, %s81_s18  ;;  %p87_p5 = scmp.lt.s32.totalorder %s81_s18, %s81_s18 }
   0xc   :  { %p88_p6 = por %p87_p5, %p86_p4 }
   0xe   :  { %p89_p7 = pnand %p88_p6, %p82_p3 }
  0x10   :  { %92 = shalt.err (!%p89_p7)
}
  0x11   :  { %s144_s19 = smov 128   ;;  %s145_s20 = smov 8  }
  0x12   :  { %21 = dma.hbm_to_vmem [thread:$0]  %s208_s0, 256, %s16_s10, [#allocation3], %s144_s19, %s144_s19, %s145_s20  }
  0x13   :  { %s146_s23 = smov [#allocation5]   ;;  %s93_s27 = scalar_lea.hbm %s209_s1, 256 }
  0x14   :  { %s27_s24 = sshll.u32 %s146_s23, 4  ;;  %p94_p8 = scmp.ne.s32.totalorder %s209_s1, %s93_s27  ;;  %s28_s24 = int_to_ptr.vmem [resolvable:$true] %s27_s24 }
  0x15   :  { %p97_p9 = scmp.lt.u32.totalorder %s93_s27, %s209_s1 }
  0x17   :  { %p99_p10 = pnand %p97_p9, %p94_p8 }
  0x19   :  { %102 = shalt.err (!%p99_p10)
}
  0x1a   :  { %s103_s4 = scalar_lea.vmem %s28_s24, 256  ;;  %p108_p12 = scmp.lt.s32.totalorder %s28_s24, %s28_s24 }
  0x1b   :  { %p104_p11 = scmp.ne.s32.totalorder %s28_s24, %s103_s4  ;;  %p109_p13 = scmp.lt.s32.totalorder %s103_s4, %s103_s4 }
  0x1d   :  { %p110_p0 = por %p109_p13, %p108_p12 }
  0x1f   :  { %p111_p1 = pnand %p110_p0, %p104_p11 }
  0x21   :  { %114 = shalt.err (!%p111_p1)
}
  0x22   :  { %33 = dma.hbm_to_vmem [thread:$0]  %s209_s1, 256, %s28_s24, [#allocation6], %s144_s19, %s144_s19, %s145_s20  }
  0x23   :  { %137 = dma.done.wait [#allocation3], 256  }
  0x24   :  { %138 = vsyncadd [#allocation3], 4294967040 }
  0x25   :  { %139 = dma.done.wait [#allocation6], 256  }
  0x26   :  { %140 = vsyncadd [#allocation6], 4294967040  ;;  %s147_s6 = smov [#allocation7]   ;;  %v40_v0 = vld [vmem:[#allocation2] sm:$0xff]  ;;  %v42_v1 = vld [vmem:[#allocation5] sm:$0xff] }
  0x27   :  { %s53_s7 = sshll.u32 %s147_s6, 4  ;;  %v41_v2 = vld [vmem:[#allocation2 + $0x8] sm:$0xff]  ;;  %v44_v3 = vadd.f32 %v42_v1, %v40_v0  ;;  %v43_v4 = vld [vmem:[#allocation5 + $0x8] sm:$0xff]  ;;  %s54_s7 = int_to_ptr.vmem [resolvable:$true] %s53_s7 }
  0x28   :  { %v45_v5 = vadd.f32 %v43_v4, %v41_v2  ;;  %s115_s8 = scalar_lea.vmem %s54_s7, 256  ;;  %p120_p3 = scmp.lt.s32.totalorder %s54_s7, %s54_s7 }
  0x29   :  { %46 = vst [vmem:[#allocation7] sm:$0xff] %v44_v3  ;;  %p116_p2 = scmp.ne.s32.totalorder %s54_s7, %s115_s8  ;;  %p121_p4 = scmp.lt.s32.totalorder %s115_s8, %s115_s8 }
  0x2a   :  { %47 = vst [vmem:[#allocation7 + $0x8] sm:$0xff] %v45_v5 }
  0x2b   :  { %p122_p5 = por %p121_p4, %p120_p3 }
  0x2d   :  { %p123_p6 = pnand %p122_p5, %p116_p2 }
  0x2f   :  { %126 = shalt.err (!%p123_p6)
}
  0x30   :  { %s127_s10 = scalar_lea.hbm %s210_s2, 256 }
  0x31   :  { %p128_p7 = scmp.ne.s32.totalorder %s210_s2, %s127_s10  ;;  %p131_p8 = scmp.lt.u32.totalorder %s127_s10, %s210_s2 }
  0x33   :  { %p133_p9 = pnand %p131_p8, %p128_p7 }
  0x35   :  { %136 = shalt.err (!%p133_p9)
}
  0x36   :  { %59 = dma.vmem_to_hbm [thread:$0]  %s54_s7, 256, %s210_s2, [#allocation4], %s144_s19, %s144_s19, %s145_s20  }
  0x37   :  { %141 = dma.done.wait [#allocation4], 256  }
  0x38   :  { %142 = vsyncadd [#allocation4], 4294967040 }
  0x39   :  { %63 = vsyncpa [#allocation3], 1 }
  0x3a   :  { %64 = vsyncpa [#allocation6], 1 }
  0x3b   :  { %65 = vsyncpa [#allocation4], 1 }

</bundles_post_ra>
